<compile_context>
chip_gen: v6e
topology: v6e:2x2x1
jax: 0.10.0
libtpu: 0.0.40
codegen_flags: <defaults>
</compile_context>

<pallas_src>
import numpy as np
import jax
import jax.numpy as jnp
from jax.experimental import pallas as pl
from jax.experimental.pallas import tpu as pltpu


# ---------------------------------------------------------------------------
# PE table
# ---------------------------------------------------------------------------

def make_positional_encoding(d_model, max_len=5000, dtype=jnp.float32):
    """Sinusoidal PE table, stored 2-D (max_len, d_model) = PyTorch pe[:, 0, :]."""
    position = jnp.arange(max_len, dtype=jnp.float32)[:, None]               # (L, 1)
    div_term = jnp.exp(
        jnp.arange(0, d_model, 2, dtype=jnp.float32) * (-np.log(10000.0) / d_model)
    )                                                                        # (D/2,)
    angles = position * div_term                                             # (L, D/2)
    pe = jnp.zeros((max_len, d_model), dtype=jnp.float32)
    pe = pe.at[:, 0::2].set(jnp.sin(angles))
    pe = pe.at[:, 1::2].set(jnp.cos(angles))
    return pe.astype(dtype)


# ---------------------------------------------------------------------------
# Kernels (pe is already in x.dtype — no per-step cast)
# ---------------------------------------------------------------------------

def _pe_add_batch_first_kernel(x_ref, pe_ref, o_ref):
    # x: (tb, ts, D), pe: (ts, D) -> broadcast over the leading batch dim.
    o_ref[...] = x_ref[...] + pe_ref[...]


def _pe_add_seq_first_3d_kernel(x_ref, pe_ref, o_ref):
    # x: (ts, tb, D), pe: (ts, D) -> broadcast over the (sublane) batch dim.
    o_ref[...] = x_ref[...] + pe_ref[...][:, None, :]


def _make_seq_first_flat_kernel(B, D):
    def kernel(x_ref, pe_ref, o_ref):
        # x: (ts, B*D) flattened view of (ts, B, D); pe: (ts, D).
        pe = pe_ref[...]
        for b in range(B):                      # B < sublane multiple on this path
            col = pl.ds(b * D, D)               # static, lane-aligned when D % 128 == 0
            o_ref[:, col] = x_ref[:, col] + pe
    return kernel


# ---------------------------------------------------------------------------
# Tile selection (padding- and generation-aware)
# ---------------------------------------------------------------------------

def _cdiv(a, b):
    return -(-a // b)


def _round_up(x, m):
    return ((x + m - 1) // m) * m


def _sublane_mult(dtype):
    # f32 -> 8, bf16/f16 -> 16, int8/fp8 -> 32 (sub-32-bit dtypes pack along sublanes).
    return max(8, 32 // jnp.dtype(dtype).itemsize)


def _padded_block_bytes(shape, dtype):
    """VMEM bytes of one block, including sublane/lane padding of the minor tile."""
    itemsize = jnp.dtype(dtype).itemsize
    sm = _sublane_mult(dtype)
    if len(shape) == 1:
        return _round_up(shape[0], 128) * itemsize
    lead = 1
    for d in shape[:-2]:
        lead *= int(d)
    r, c = shape[-2], shape[-1]
    return lead * _round_up(int(r), sm) * _round_up(int(c), 128) * itemsize


def _vmem_budget_and_cap():
    try:
        cap = int(pltpu.get_tpu_info().vmem_capacity_bytes)   # 128 MiB v5e/v6e, 64 MiB v7x
    except Exception:
        cap = 64 << 20
    # Padded working-set target, safely under every generation's scoped default.
    budget = (16 << 20) if cap >= (96 << 20) else (10 << 20)
    return budget, cap


def _choose_ts(S, sm, fits):
    """Largest ts (multiple of sm) that fits; then prefer >= 2 seq grid steps."""
    ts_cap = _round_up(max(S, 1), sm)
    ts = sm
    while ts * 2 <= ts_cap and fits(ts * 2):
        ts *= 2
    # >= 2 steps along a "parallel" axis lets v7x shard the grid across its 2 TCs.
    if S > sm:
        while ts >= S and ts > sm:
            ts = max(sm, _round_up(ts // 2, sm))
    return ts


# ---------------------------------------------------------------------------
# Forward
# ---------------------------------------------------------------------------

def positional_encoding_forward(x, pe, batch_first=False, *, donate_x=False):
    """x: (S, B, D) if not batch_first else (B, S, D); pe: (max_len, D) or (max_len, 1, D)."""
    if pe.ndim == 3:                      # accept the PyTorch-shaped buffer
        pe = pe[:, 0, :]

    if batch_first:
        B, S, D = x.shape
    else:
        S, B, D = x.shape

    if pe.shape[1] != D:
        raise ValueError(f"pe feature dim {pe.shape[1]} != x feature dim {D}")
    if S > pe.shape[0]:
        raise ValueError(f"sequence length {S} exceeds positional table max_len {pe.shape[0]}")

    dtype = x.dtype
    # Matches PyTorch `self.pe[:S].to(x)`: pe is cast to x.dtype once, add runs in x.dtype.
    pe = pe.astype(dtype)
    itemsize = jnp.dtype(dtype).itemsize
    sm = _sublane_mult(dtype)
    budget, cap = _vmem_budget_and_cap()

    unflatten = None

    if batch_first:
        # x (B, S, D): minor dims of the block are (ts, D) -> dense for any B.
        def ws(tb, ts):
            return (4 * _padded_block_bytes((tb, ts, D), dtype)
                    + 2 * _padded_block_bytes((ts, D), dtype))

        ts = _choose_ts(S, sm, lambda t: ws(1, t) <= budget)
        tb = 1
        while tb * 2 <= B and ws(tb * 2, ts) <= budget:
            tb *= 2
        if _cdiv(S, ts) * _cdiv(B, tb) < 2 and B > 1:     # keep both v7x TCs busy
            tb = max(1, (B + 1) // 2)

        grid = (_cdiv(S, ts), _cdiv(B, tb))               # batch innermost -> pe tile reused
        kernel = _pe_add_batch_first_kernel
        x_in = x
        x_spec = pl.BlockSpec((tb, ts, D), lambda si, bi: (bi, si, 0))
        pe_spec = pl.BlockSpec((ts, D), lambda si, bi: (si, 0))
        out_shape = jax.ShapeDtypeStruct(x.shape, dtype)
        working_set = ws(tb, ts)

    elif B % sm == 0:
        # x (S, B, D) with B a sublane multiple: (ts, tb, D) blocks, dense (tb, D) minor tile.
        def ws(ts, tb):
            return (4 * _padded_block_bytes((ts, tb, D), dtype)
                    + 2 * _padded_block_bytes((ts, D), dtype))

        tb = B
        while tb > sm and ws(sm, tb) > budget:
            tb = max(sm, (tb // 2 // sm) * sm)
        ts = _choose_ts(S, sm, lambda t: ws(t, tb) <= budget)
        if _cdiv(S, ts) * _cdiv(B, tb) < 2 and tb > sm:
            tb = max(sm, _round_up(tb // 2, sm))

        grid = (_cdiv(S, ts), _cdiv(B, tb))               # batch innermost -> pe tile reused
        kernel = _pe_add_seq_first_3d_kernel
        x_in = x
        x_spec = pl.BlockSpec((ts, tb, D), lambda si, bi: (si, bi, 0))
        pe_spec = pl.BlockSpec((ts, D), lambda si, bi: (si, 0))
        out_shape = jax.ShapeDtypeStruct(x.shape, dtype)
        working_set = ws(ts, tb)

    else:
        # x (S, B, D) with small / ragged B: flatten to (S, B*D) (free minor-dim collapse)
        # so blocks are sublane- and lane-dense; pe broadcast over B is done with B static
        # column slices inside the kernel (no padded vregs, no masked partial stores).
        def ws(ts):
            return (4 * _padded_block_bytes((ts, B * D), dtype)
                    + 2 * _padded_block_bytes((ts, D), dtype))

        ts = _choose_ts(S, sm, lambda t: ws(t) <= budget)
        grid = (_cdiv(S, ts),)
        kernel = _make_seq_first_flat_kernel(B, D)
        x_in = x.reshape(S, B * D)
        unflatten = (S, B, D)
        x_spec = pl.BlockSpec((ts, B * D), lambda si: (si, 0))
        pe_spec = pl.BlockSpec((ts, D), lambda si: (si, 0))
        out_shape = jax.ShapeDtypeStruct((S, B * D), dtype)
        working_set = ws(ts)

    # If the ragged seq tiling would read pe rows past max_len, pad the table once (tiny).
    S_pad = _cdiv(S, ts) * ts
    if S_pad > pe.shape[0]:
        pe = jnp.concatenate(
            [pe, jnp.zeros((S_pad - pe.shape[0], D), pe.dtype)], axis=0)

    # Explicit scoped-VMEM limit: padded working set with >= 2x headroom, under physical.
    vmem_floor = (32 << 20) if cap >= (96 << 20) else (24 << 20)
    vmem_limit = int(min(max(vmem_floor, 2 * working_set), cap - (8 << 20)))

    cost = pl.CostEstimate(
        flops=S * B * D,
        transcendentals=0,
        bytes_accessed=(2 * S * B * D + S * D) * itemsize,
    )

    out = pl.pallas_call(
        kernel,
        out_shape=out_shape,
        grid_spec=pltpu.PrefetchScalarGridSpec(
            num_scalar_prefetch=0,
            grid=grid,
            in_specs=[x_spec, pe_spec],
            out_specs=x_spec,
        ),
        compiler_params=pltpu.CompilerParams(
            dimension_semantics=("parallel",) * len(grid),
            vmem_limit_bytes=vmem_limit,
        ),
        cost_estimate=cost,
        input_output_aliases=({0: 0} if donate_x else {}),
    )(x_in, pe)

    if unflatten is not None:
        out = out.reshape(unflatten)
    return out


if __name__ == "__main__":
    key = jax.random.PRNGKey(0)

    d_model = 128        # multiple of 128 -> lane-dense blocks (unmasked stores)
    seq_len = 16
    batch = 2
    max_len = 64

    pe = make_positional_encoding(d_model, max_len=max_len)

    # seq-first (module default, batch_first=False): x is (S, B, D); B=2 -> flattened path
    x = jax.random.normal(key, (seq_len, batch, d_model), dtype=jnp.float32)
    out = jax.block_until_ready(positional_encoding_forward(x, pe, batch_first=False))
    ref = x + pe[:seq_len][:, None, :]
    assert np.allclose(np.asarray(out), np.asarray(ref), atol=1e-6, rtol=1e-6), \
        "mismatch (seq-first, small batch)"

    # batch-first path: x is (B, S, D)
    x_bf = jnp.transpose(x, (1, 0, 2))
    out_bf = jax.block_until_ready(positional_encoding_forward(x_bf, pe, batch_first=True))
    ref_bf = x_bf + pe[:seq_len][None, :, :]
    assert np.allclose(np.asarray(out_bf), np.asarray(ref_bf), atol=1e-6, rtol=1e-6), \
        "mismatch (batch-first)"

    # seq-first with a sublane-multiple batch -> 3-D tiled path
    x3 = jax.random.normal(jax.random.PRNGKey(1), (seq_len, 8, d_model), dtype=jnp.float32)
    out3 = jax.block_until_ready(positional_encoding_forward(x3, pe, batch_first=False))
    ref3 = x3 + pe[:seq_len][:, None, :]
    assert np.allclose(np.asarray(out3), np.asarray(ref3), atol=1e-6, rtol=1e-6), \
        "mismatch (seq-first, sublane-multiple batch)"

    print("KERNEL_OK")
</pallas_src>

<mosaic_0001>
module attributes {stable_mosaic.version = 11 : i64} {
  func.func @kernel(%arg0: i32, %arg1: memref<8x256xf32, #tpu.memory_space<vmem>>, %arg2: memref<8x128xf32, #tpu.memory_space<vmem>>, %arg3: memref<8x256xf32, #tpu.memory_space<vmem>>) attributes {dimension_semantics = [#tpu.dimension_semantics<parallel>], iteration_bounds = array<i64: 2>, scalar_prefetch = 0 : i64, scratch_operands = 0 : i64, tpu.core_type = #tpu.core_type<tc>, window_params = [{transform_indices = @transform_0, window_bounds = array<i64: 8, 256>}, {transform_indices = @transform_1, window_bounds = array<i64: 8, 128>}, {transform_indices = @transform_2, window_bounds = array<i64: 8, 256>}]} {
    %c0 = arith.constant 0 : index
    %c0_0 = arith.constant 0 : index
    %0 = vector.load %arg2[%c0, %c0_0] : memref<8x128xf32, #tpu.memory_space<vmem>>, vector<8x128xf32>
    %c0_1 = arith.constant 0 : index
    %c0_2 = arith.constant 0 : index
    %1 = vector.load %arg1[%c0_1, %c0_2] : memref<8x256xf32, #tpu.memory_space<vmem>>, vector<8x128xf32>
    %2 = arith.addf %1, %0 : vector<8x128xf32>
    %c0_3 = arith.constant 0 : index
    %c0_4 = arith.constant 0 : index
    %3 = vector.load %arg3[%c0_3, %c0_4] : memref<8x256xf32, #tpu.memory_space<vmem>>, vector<8x128xf32>
    tpu.vector_store %arg3[%c0_3, %c0_4], %2 {strides = array<i32>} : memref<8x256xf32, #tpu.memory_space<vmem>>, vector<8x128xf32>,
    %c0_5 = arith.constant 0 : index
    %c128 = arith.constant 128 : index
    %4 = vector.load %arg1[%c0_5, %c128] : memref<8x256xf32, #tpu.memory_space<vmem>>, vector<8x128xf32>
    %5 = arith.addf %4, %0 : vector<8x128xf32>
    %c0_6 = arith.constant 0 : index
    %c128_7 = arith.constant 128 : index
    %6 = vector.load %arg3[%c0_6, %c128_7] : memref<8x256xf32, #tpu.memory_space<vmem>>, vector<8x128xf32>
    tpu.vector_store %arg3[%c0_6, %c128_7], %5 {strides = array<i32>} : memref<8x256xf32, #tpu.memory_space<vmem>>, vector<8x128xf32>,
    return
  }
  func.func @transform_0(%arg0: i32) -> (i32, i32) {
    %c0_i32 = arith.constant 0 : i32
    %c0_i32_0 = arith.constant 0 : i32
    return %arg0, %c0_i32 : i32, i32
  }
  func.func @transform_1(%arg0: i32) -> (i32, i32) {
    %c0_i32 = arith.constant 0 : i32
    %c0_i32_0 = arith.constant 0 : i32
    return %arg0, %c0_i32 : i32, i32
  }
  func.func @transform_2(%arg0: i32) -> (i32, i32) {
    %c0_i32 = arith.constant 0 : i32
    %c0_i32_0 = arith.constant 0 : i32
    return %arg0, %c0_i32 : i32, i32
  }
}

</mosaic_0001>

<bundles_post_ra>
// kernel: tpu_custom_call.1
= control target key start
LH: loop header
LB: loop body
LE: loop exit
PB: predicated region body
PF: predicated region fallthrough
CT: control target
= control target key end

     0   :  { %7 = vsyncpa [#allocation3], 0  ;;  %s721_s0 = inlined_call_operand.hbm [shape: f32[16,256], index: 0, kind: input, shape index: {}]   ;;  %s722_s1 = inlined_call_operand.hbm [shape: f32[64,128], index: 1, kind: input, shape index: {}]   ;;  %s723_s2 = inlined_call_operand.hbm [shape: f32[16,256], index: 2, kind: output, shape index: {}]  }
   0x1   :  { %9 = vsyncpa [#allocation3 + $0x1], 0 }
   0x2   :  { %10 = vsyncpa [#allocation6], 0 }
   0x3   :  { %12 = vsyncpa [#allocation6 + $0x1], 0 }
   0x4   :  { %13 = vsyncpa [#allocation4], 0 }
   0x5   :  { %15 = vsyncpa [#allocation4 + $0x1], 0  ;;  %s526_s9 = smov 0   ;;  %s528_s10 = smov 0  }
   0x6   :  { %s530_s11 = smov 0   ;;  %s532_s12 = smov 0  }
   0x7 LB: > { %s547_s13 = sadd.s32 4294967295, %s506_s12   ;;  %s312_s14 = sadd.s32 4294967294, %s506_s12   ;;  %s506_s12 = sphi %s532_s12, %s742_s12   ;;  %s502_s11 = sphi %s530_s11, %s741_s11   ;;  %s498_s10 = sphi %s528_s10, %s740_s10   ;;  %s494_s9 = sphi %s526_s9, %s739_s9  }
   0x8   : > { %s551_s15 = sadd.s32 1, %s506_s12   ;;  %s28_s16 = sadd.s32 1, %s502_s11 }
   0x9   : > { %s25_s17 = ssub.s32 %s506_s12, %s551_s15  ;;  %p35_p0 = scmp.ne.s32.totalorder %s502_s11, %s498_s10 }
   0xa   : > { %p26_p1 = scmp.eq.s32.totalorder %s25_s17, 0  ;;  %p36_p2 = scmp.eq.s32.totalorder %s506_s12, 0 }
   0xb   : > { %p41_p3 = scmp.ne.s32.totalorder %s498_s10, %s494_s9  ;;  %p42_p4 = scmp.eq.s32.totalorder %s547_s13, 0 }
   0xc   : > { %s563_s18 = scalar_select %p26_p1, %s502_s11, %s28_s16  }
   0xd   : > { %p565_p5 = por %p36_p2, %p35_p0  ;;  %p569_p6 = por %p42_p4, %p41_p3 }
   0xe   : > { %p91_p7 = scmp.eq.s32.totalorder %s547_s13, 1  ;;  %p97_p8 = scmp.eq.s32.totalorder %s312_s14, 1 }
   0xf   : > { %s727_s20 = scalar_select %p569_p6, 1, 0 }
  0x10   : > { %p348_p10 = scmp.lt.s32.totalorder %s506_s12, 2  ;;  %p576_p11 = por %p91_p7, %p35_p0 }
  0x11   : > { %p580_p12 = por %p97_p8, %p41_p3  ;;  %s585_s23 = sand.u32 1, %s502_s11  }
  0x12   : > { %s728_s21 = scalar_select %p576_p11, 1, 0 }
  0x13   : > { %s729_s22 = scalar_select %p580_p12, 1, 0 }
  0x14   : > { %s329_s24 = sshll.u32 %s506_s12, 8  ;;  %s315_s25 = sshll.u32 %s585_s23, 4 }
  0x15   : > { %s592_s28 = scalar_lea.hbm %s721_s0, %s329_s24  ;;  %s121_s29 = scalar_lea.vmem [#allocation2], %s315_s25 }
  0x16   : > { %s129_s30 = sshll.u32 %s121_s29, 4  ;;  %p596_p13 = pnand %p348_p10, %p565_p5  ;;  %s600_s30 = int_to_ptr.vmem [resolvable:$true] %s129_s30 }
  0x17   : > { %s118_s4 = scalar_lea.sflag [#allocation3], %s585_s23  ;;  %s382_s5 = scalar_lea.hbm %s592_s28, 256 }
  0x18   : > { %p383_p2 = scmp.ne.s32.totalorder %s592_s28, %s382_s5  ;;  %p384_p3 = pneg %p596_p13 }
  0x19   : > { %s387_s8 = scalar_lea.hbm %s721_s0, 512  ;;  %p388_p5 = scmp.lt.s32.totalorder %s592_s28, %s721_s0 }
  0x1a   : > { %p385_p4 = pnand %p384_p3, %p383_p2  ;;  %p389_p8 = scmp.lt.s32.totalorder %s387_s8, %s382_s5 }
  0x1c   : > { %p386_p7 = pneg %p385_p4  ;;  %p390_p10 = por %p389_p8, %p388_p5 }
  0x1e   : > { %p391_p9 = pnand %p390_p10, %p386_p7 }
  0x20   : > { %394 = shalt.err (!%p391_p9)
}
  0x21   : > { %s395_s17 = scalar_lea.vmem %s600_s30, 256  ;;  %s508_s19 = smov [#allocation2]  }
  0x22   : > { %p396_p0 = scmp.ne.s32.totalorder %s600_s30, %s395_s17  ;;  %s400_s24 = sshll.u32 %s508_s19, 4  ;;  %s401_s24 = int_to_ptr.vmem [resolvable:$false] %s400_s24 }
  0x23   : > { %s402_s25 = scalar_lea.vmem %s401_s24, 512  ;;  %p403_p1 = scmp.lt.s32.totalorder %s600_s30, %s401_s24 }
  0x24   : > { %p398_p2 = pnand %p396_p0, %p384_p3  ;;  %p404_p12 = scmp.lt.s32.totalorder %s402_s25, %s395_s17 }
  0x26   : > { %p399_p4 = pneg %p398_p2  ;;  %p405_p11 = por %p404_p12, %p403_p1 }
  0x28   : > { %p406_p5 = pnand %p405_p11, %p399_p4 }
  0x2a   : > { %409 = shalt.err (!%p406_p5)
}
  0x2b   : > { %340 = dma.hbm_to_vmem [thread:$0]  (!%p596_p13), %s592_s28, 256, %s600_s30, %s118_s4  }
  0x2c   : > { %p731_p9 = scmp.lt.s32.totalorder %s506_s12, 3  ;;  %p732_p0 = scmp.ge.s32.totalorder %s506_s12, 1 }
  0x2d   : > { %s318_s27 = sshll.u32 %s585_s23, 3  ;;  %s319_s29 = sshll.u32 %s506_s12, 7 }
  0x2e   : > { %p633_p7 = pnand %p732_p0, %p731_p9  ;;  %s642_s7 = scalar_lea.hbm %s722_s1, %s319_s29 }
  0x2f   : > { %s140_s8 = scalar_lea.vmem [#allocation5], %s318_s27  ;;  %s137_s28 = scalar_lea.sflag [#allocation6], %s585_s23 }
  0x30   : > { %s733_s26 = scalar_select %p633_p7, 1, 0 }
  0x31   : > { %s147_s14 = sshll.u32 %s140_s8, 4  ;;  %s410_s30 = scalar_lea.hbm %s642_s7, 128  ;;  %s148_s14 = int_to_ptr.vmem [resolvable:$true] %s147_s14 }
  0x32   : > { %p411_p11 = scmp.ne.s32.totalorder %s642_s7, %s410_s30  ;;  %s415_s17 = scalar_lea.hbm %s722_s1, 1024 }
  0x33   : > { %p416_p8 = scmp.lt.s32.totalorder %s642_s7, %s722_s1  ;;  %p417_p10 = scmp.lt.s32.totalorder %s415_s17, %s410_s30 }
  0x34   : > { %p413_p12 = pnand %p411_p11, %p384_p3 }
  0x35   : > { %p418_p2 = por %p417_p10, %p416_p8 }
  0x36   : > { %p414_p1 = pneg %p413_p12 }
  0x38   : > { %p419_p4 = pnand %p418_p2, %p414_p1 }
  0x3a   : > { %422 = shalt.err (!%p419_p4)
}
  0x3b   : > { %s423_s25 = scalar_lea.vmem %s148_s14, 128  ;;  %s509_s23 = smov [#allocation5]  }
  0x3c   : > { %p424_p5 = scmp.ne.s32.totalorder %s148_s14, %s423_s25  ;;  %s428_s27 = sshll.u32 %s509_s23, 4  ;;  %s429_s27 = int_to_ptr.vmem [resolvable:$false] %s428_s27 }
  0x3d   : > { %s430_s29 = scalar_lea.vmem %s429_s27, 256  ;;  %p431_p11 = scmp.lt.s32.totalorder %s148_s14, %s429_s27 }
  0x3e   : > { %p426_p9 = pnand %p424_p5, %p384_p3  ;;  %p432_p12 = scmp.lt.s32.totalorder %s430_s29, %s423_s25 }
  0x40   : > { %p427_p0 = pneg %p426_p9  ;;  %p433_p6 = por %p432_p12, %p431_p11 }
  0x42   : > { %p434_p7 = pnand %p433_p6, %p427_p0 }
  0x44   : > { %437 = shalt.err (!%p434_p7)
}
  0x45   : > { %343 = dma.hbm_to_vmem [thread:$0]  (!%p596_p13), %s642_s7, 128, %s148_s14, %s137_s28  }
  0x46   : > { %p734_p1 = scmp.ne.s32.totalorder %s733_s26, 0 }
  0x47   : > { %s666_s5 = sand.u32 (!%p734_p1), 1, %s498_s10   ;;  %p735_p3 = scmp.ne.s32.totalorder (!%p734_p1), %s727_s20, 0 }
  0x48   : > { %156 = sbr.rel (%p734_p1) target bundleno = 106 (0x6a), region = 28  ;;  %s321_s6 = sshll.u32 (!%p734_p1), %s666_s5, 4 }
  0x49   : > { %s159_s8 = scalar_lea.sflag (!%p734_p1), [#allocation3], %s666_s5  ;;  %s162_s30 = scalar_lea.vmem (!%p734_p1), [#allocation2], %s321_s6 }
  0x4d   : > { %481 = dma.done.wait (%p735_p3), %s159_s8, 256  }
  0x4e   : > { %483 = vsyncadd (%p735_p3), %s159_s8, 4294967040  ;;  %s322_s3 = sshll.u32 %s666_s5, 3  ;;  %s168_s26 = scalar_lea.sflag [#allocation6], %s666_s5 }
  0x4f   : > { %s171_s7 = scalar_lea.vmem [#allocation5], %s322_s3 }
  0x50   : > { %485 = dma.done.wait (%p735_p3), %s168_s26, 128  }
  0x51   : > { %487 = vsyncadd (%p735_p3), %s168_s26, 4294967168  ;;  %s196_s14 = scalar_lea.vmem [#allocation7], %s321_s6  ;;  %s330_s4 = sshll.u32 %s547_s13, 8  ;;  %v197_v0 = vld [vmem:[%s171_s7] sm:$0xff]  ;;  %v201_v2 = vld [vmem:[%s162_s30 + $0x8] sm:$0xff] }
  0x52   : > { %s219_s28 = sshll.u32 %s196_s14, 4  ;;  %v198_v1 = vld [vmem:[%s162_s30] sm:$0xff]  ;;  %v202_v4 = vadd.f32 %v201_v2, %v197_v0  ;;  %s217_s20 = scalar_lea.hbm %s723_s2, %s330_s4  ;;  %s681_s28 = int_to_ptr.vmem [resolvable:$true] %s219_s28 }
  0x53   : > { %v199_v3 = vadd.f32 %v198_v1, %v197_v0  ;;  %s205_s19 = scalar_lea.sflag [#allocation4], %s666_s5  ;;  %s438_s24 = scalar_lea.vmem %s681_s28, 256 }
  0x54   : > { %203 = vst [vmem:[%s196_s14 + $0x8] sm:$0xff] %v202_v4  ;;  %p439_p6 = scmp.ne.s32.totalorder %s681_s28, %s438_s24  ;;  %p736_p13 = scmp.ne.s32.totalorder %s728_s21, 0 }
  0x55   : > { %200 = vst [vmem:[%s196_s14] sm:$0xff] %v199_v3  ;;  %s510_s13 = smov [#allocation7]  }
  0x56   : > { %p440_p7 = pnand %p439_p6, %p736_p13  ;;  %s442_s25 = sshll.u32 %s510_s13, 4  ;;  %s443_s25 = int_to_ptr.vmem [resolvable:$false] %s442_s25 }
  0x57   : > { %s444_s23 = scalar_lea.vmem %s443_s25, 512  ;;  %p445_p10 = scmp.lt.s32.totalorder %s681_s28, %s443_s25 }
  0x58   : > { %p441_p8 = pneg %p440_p7  ;;  %p446_p2 = scmp.lt.s32.totalorder %s444_s23, %s438_s24 }
  0x5a   : > { %p447_p4 = por %p446_p2, %p445_p10 }
  0x5c   : > { %p448_p5 = pnand %p447_p4, %p441_p8 }
  0x5e   : > { %451 = shalt.err (!%p448_p5)
}
  0x5f   : > { %s452_s27 = scalar_lea.hbm %s217_s20, 256  ;;  %s456_s6 = scalar_lea.hbm %s723_s2, 512 }
  0x60   : > { %p453_p9 = scmp.ne.s32.totalorder %s217_s20, %s452_s27  ;;  %p457_p12 = scmp.lt.s32.totalorder %s217_s20, %s723_s2 }
  0x61   : > { %p458_p1 = scmp.lt.s32.totalorder %s456_s6, %s452_s27 }
  0x62   : > { %p454_p0 = pnand %p453_p9, %p736_p13 }
  0x63   : > { %p459_p3 = por %p458_p1, %p457_p12 }
  0x64   : > { %p455_p11 = pneg %p454_p0 }
  0x66   : > { %p460_p6 = pnand %p459_p3, %p455_p11 }
  0x68   : > { %463 = shalt.err (!%p460_p6)
}
  0x69   : > { %335 = dma.vmem_to_hbm [thread:$0]  (%p736_p13), %s681_s28, 256, %s217_s20, %s205_s19  }
  0x6a PF: > { %s231_s3 = sand.u32 1, %s494_s9   ;;  %p737_p7 = scmp.ne.s32.totalorder %s729_s22, 0 }
  0x6b   : > { %p738_p8 = scmp.ge.s32.totalorder %s506_s12, 2  ;;  %s232_s26 = scalar_lea.sflag [#allocation4], %s231_s3 }
  0x6d   : > { %p345_p10 = pnand %p738_p8, %p737_p7 }
  0x6f   : > { %p346_p2 = pneg %p345_p10 }
  0x71   : > { %489 = dma.done.wait (%p346_p2), %s232_s26, 256  }
  0x72   : > { %491 = vsyncadd (%p346_p2), %s232_s26, 4294967040  ;;  %p18_p4 = scmp.ge.s32.totalorder %s551_s15, 4   ;;  %s739_s9 = smov %s498_s10 }
  0x73   : > { %s740_s10 = smov %s502_s11  ;;  %s741_s11 = smov %s563_s18 }
  0x74   : > { %s742_s12 = smov %s551_s15  ;;  %20 = sbr.rel (!%p18_p4) target bundleno = 7 (0x7), region = 86 }
  0x79   :  { %237 = vsyncpa [#allocation3], 1 }
  0x7a   :  { %239 = vsyncpa [#allocation3 + $0x1], 1 }
  0x7b   :  { %240 = vsyncpa [#allocation6], 1 }
  0x7c   :  { %242 = vsyncpa [#allocation6 + $0x1], 1 }
  0x7d   :  { %243 = vsyncpa [#allocation4], 1 }
  0x7e   :  { %245 = vsyncpa [#allocation4 + $0x1], 1 }

</bundles_post_ra>
